<compile_context>
chip_gen: v7x
topology: tpu7x:2x2x1
jax: 0.10.0
libtpu: 0.0.40
codegen_flags: <defaults>
</compile_context>

<pallas_src>
import functools

import jax
import jax.numpy as jnp
from jax.experimental import pallas as pl
from jax.experimental.pallas import tpu as pltpu


def _sigmoid_bce_sum_kernel(x_ref, t_ref, o_ref, *, full_rows, rem,
                            first_masked_block, need_mask):
    k = pl.program_id(1)
    gb = pl.program_id(0) * pl.num_programs(1) + k   # global row-block index

    @pl.when(k == 0)
    def _():
        o_ref[...] = jnp.zeros_like(o_ref)

    x = x_ref[...].astype(jnp.float32)
    t = t_ref[...].astype(jnp.float32)

    # BCE-with-logits identity (exact wherever f32 sigmoid does not saturate):
    #   -(t*log(p) + (1-t)*log(1-p)) == max(x,0) - x*t + log(1 + exp(-|x|))
    # 2 transcendentals + ~7 VALU ops per element.
    log1p_e = jnp.log(1.0 + jnp.exp(-jnp.abs(x)))
    loss = jnp.maximum(x, 0.0) - x * t + log1p_e

    # Emulate PyTorch nn.BCELoss(sigmoid(x)) f32 tail behaviour exactly:
    #   x >  24*ln2      : sigmoid rounds to 1.0 -> log(1-p) = -inf -> clamp -100
    #   x < -ln(f32_max) : sigmoid rounds to 0.0 -> log(p)   = -inf -> clamp -100
    # In between both stable log terms are > -90, so no extra -100 clamps needed.
    hundred_t = jnp.float32(100.0) * t
    loss = jnp.where(x > jnp.float32(16.635532), jnp.float32(100.0) - hundred_t, loss)
    loss = jnp.where(x < jnp.float32(-88.722839), hundred_t, loss)

    rt, C = loss.shape

    def _accumulate(blk):
        # (rt, C) -> (8, C) fold: the reshape only splits the sublane dim by a
        # multiple of 8 (layout no-op) and the axis-0 sum is plain vreg adds,
        # so no per-step cross-lane XLU work; the single cross-lane reduction
        # happens once, in the wrapper.
        o_ref[...] += blk.reshape(rt // 8, 8, C).sum(axis=0)

    if need_mask:
        # Only the ragged-tail / overhang blocks pay for the mask.
        @pl.when(gb >= first_masked_block)
        def _():
            row = gb * rt + jax.lax.broadcasted_iota(jnp.int32, (rt, 1), 0)
            lane = jax.lax.broadcasted_iota(jnp.int32, (1, C), 1)
            valid = (row < full_rows) | ((row == full_rows) & (lane < rem))
            _accumulate(jnp.where(valid, loss, jnp.float32(0.0)))

        @pl.when(gb < first_masked_block)
        def _():
            _accumulate(loss)
    else:
        _accumulate(loss)


def _round_up(a, m):
    return (a + m - 1) // m * m


def _tensorcores_per_chip():
    """Best-effort TensorCore-per-chip count (None if unknown)."""
    try:
        info = pltpu.get_tpu_info()
        for name in ("num_cores", "core_count", "cores_per_chip", "num_tensorcores"):
            v = getattr(info, name, None)
            if isinstance(v, int) and 1 <= v <= 8:
                return v
    except Exception:
        pass
    try:
        v = getattr(jax.devices()[0], "num_cores", None)
        if isinstance(v, int) and 1 <= v <= 8:
            return v
    except Exception:
        pass
    return None


def _best_free_width(n):
    """Lowest-lane-waste divisor of n in [32, 2048] to use as the lane width
    (multiples of 128 are zero-waste and preferred).  None if no such divisor."""
    best_key, best_d = None, None
    for d in range(min(2048, n), 31, -1):
        if n % d:
            continue
        frac = ((-d) % 128) / d        # padded-lane fraction of each row
        key = (frac, -d)
        if best_key is None or key < best_key:
            best_key, best_d = key, d
        if frac == 0.0:
            break                      # largest multiple-of-128 divisor found
    return best_d


def _as_lane_dense_2d(x, t):
    """Return (x2d, t2d, n_valid): a lane-friendly 2D view of the (flattened)
    inputs.  Uses free reshapes of the contiguous buffer whenever possible and
    pads (relying on the in-kernel element mask) only for hostile sizes."""
    n = x.size
    # 1) Natural trailing dim already a multiple of 128: keep it.
    if x.ndim >= 2 and x.shape[-1] % 128 == 0 and 0 < x.shape[-1] <= 65536:
        c = x.shape[-1]
        return x.reshape(-1, c), t.reshape(-1, c), n
    # 2) Free re-factorization of the flat, contiguous buffer.
    d = _best_free_width(n)
    if d is not None:
        return x.reshape(-1, d), t.reshape(-1, d), n
    # 3) Hostile size (prime-ish): pad once to a 128-lane view; the padded
    #    elements are zeroed by the in-kernel element-level validity mask.
    xf, tf = x.reshape(-1), t.reshape(-1)
    pad = (-n) % 128
    if pad:
        xf = jnp.pad(xf, (0, pad))
        tf = jnp.pad(tf, (0, pad))
    return xf.reshape(-1, 128), tf.reshape(-1, 128), n


def sigmoid_bce_sum(outputs, targets, *, row_tile=None,
                    target_block_bytes=2 * 1024 * 1024, force_parallel=None):
    """Sum of elementwise BCE(sigmoid(outputs), targets). Returns scalar f32."""
    assert outputs.shape == targets.shape
    if outputs.size == 0:
        return jnp.zeros((), jnp.float32)

    x2, t2, n_valid = _as_lane_dense_2d(outputs, targets)
    R, C = x2.shape

    # Sublane granularity for packed dtypes (f32: 8, bf16: 16, int8/fp8: 32).
    itemsize = int(min(jnp.dtype(x2.dtype).itemsize, jnp.dtype(t2.dtype).itemsize))
    row_mult = {4: 8, 2: 16, 1: 32}.get(itemsize, 8)

    if row_tile is None:
        # ~2 MiB of DMA'd data per input per grid step (dtype-aware): amortizes
        # the ~0.35us per-step overhead while 2 inputs x 2 pipeline buffers stay
        # within every generation's default scoped-VMEM budget.
        row_tile = max(row_mult, target_block_bytes // (itemsize * max(C, 1)))
    row_tile = max(row_mult, _round_up(int(row_tile), row_mult))
    row_tile = min(row_tile, _round_up(R, row_mult))

    num_blocks = pl.cdiv(R, row_tile)

    # 2-way split of the row-block loop ("parallel" axis -> both TensorCores on
    # v7x).  Odd block counts use ceil-div plus a clamped, fully-masked overhang
    # block; detected single-TC chips skip the redundant overhang read.
    if force_parallel is True:
        P = 2 if num_blocks >= 2 else 1
    elif force_parallel is False:
        P = 1
    else:
        cores = _tensorcores_per_chip()
        if cores is not None and cores >= 2:
            P = 2 if num_blocks >= 2 else 1
        elif cores == 1:
            P = 1
        else:  # unknown generation: split when free (even) or clearly worth it
            P = 2 if (num_blocks >= 2 and (num_blocks % 2 == 0 or num_blocks >= 9)) else 1
    K = pl.cdiv(num_blocks, P)

    # Static element-level validity info for the flattened input.
    full_rows = n_valid // C            # rows that are entirely valid
    rem = n_valid % C                   # valid lanes in row `full_rows`
    covered_rows = P * K * row_tile     # rows the grid touches (padding/overhang incl.)
    need_mask = covered_rows > full_rows
    first_masked_block = full_rows // row_tile

    kernel = functools.partial(
        _sigmoid_bce_sum_kernel, full_rows=full_rows, rem=rem,
        first_masked_block=first_masked_block, need_mask=need_mask)

    nb, Kc = num_blocks, K
    if P * K > num_blocks:
        in_idx = lambda p, k: (jnp.minimum(p * Kc + k, nb - 1), 0)  # clamp overhang
    else:
        in_idx = lambda p, k: (p * Kc + k, 0)

    partials = pl.pallas_call(
        kernel,
        out_shape=jax.ShapeDtypeStruct((P * 8, C), jnp.float32),
        grid_spec=pltpu.PrefetchScalarGridSpec(
            num_scalar_prefetch=0,
            grid=(P, K),
            in_specs=[
                pl.BlockSpec((row_tile, C), in_idx),
                pl.BlockSpec((row_tile, C), in_idx),
            ],
            # The output block IS the per-slice (8, C) accumulator: same block
            # index for every k (revisiting output), lane-dense, unmasked vst.
            out_specs=pl.BlockSpec((8, C), lambda p, k: (p, 0)),
        ),
        compiler_params=pltpu.CompilerParams(
            dimension_semantics=("parallel", "arbitrary")),
    )(x2, t2)

    # Single tiny cross-lane reduction of the (P*8, C) partial sums.
    return jnp.sum(partials)


def _reference(outputs, targets):
    # Mirrors PyTorch: sigmoid -> BCELoss(reduction='none') -> sum (f32 math).
    p = jax.nn.sigmoid(outputs.astype(jnp.float32))
    t = targets.astype(jnp.float32)
    log_p = jnp.maximum(jnp.log(p), -100.0)
    log_1mp = jnp.maximum(jnp.log(1.0 - p), -100.0)
    return jnp.sum(-(t * log_p + (1.0 - t) * log_1mp))


if __name__ == "__main__":
    key = jax.random.PRNGKey(0)
    k1, k2, k3, k4 = jax.random.split(key, 4)

    # Small (batch, num_classes) logits; batch intentionally ragged.
    B, C = 37, 128
    outputs = jax.random.normal(k1, (B, C), dtype=jnp.float32) * 3.0
    targets = jax.random.uniform(k2, (B, C), dtype=jnp.float32)

    ref_full = _reference(outputs, targets)
    ref_part = _reference(outputs[:32], targets[:32])

    # 1) auto block size: single block + gated row-tail mask
    loss_auto = jax.block_until_ready(sigmoid_bce_sum(outputs, targets))
    # 2) small row tile: multi-step reduction grid, interior blocks unmasked
    loss_tiled = jax.block_until_ready(sigmoid_bce_sum(outputs, targets, row_tile=8))
    # 3) even block count + forced 2-way split (no overhang)
    loss_par = jax.block_until_ready(
        sigmoid_bce_sum(outputs[:32], targets[:32], row_tile=8, force_parallel=True))
    # 4) odd block count + forced 2-way split: clamped, fully-masked overhang block
    loss_ovh = jax.block_until_ready(
        sigmoid_bce_sum(outputs, targets, row_tile=8, force_parallel=True))

    assert jnp.allclose(loss_auto, ref_full, rtol=1e-4, atol=1e-2), (loss_auto, ref_full)
    assert jnp.allclose(loss_tiled, ref_full, rtol=1e-4, atol=1e-2), (loss_tiled, ref_full)
    assert jnp.allclose(loss_par, ref_part, rtol=1e-4, atol=1e-2), (loss_par, ref_part)
    assert jnp.allclose(loss_ovh, ref_full, rtol=1e-4, atol=1e-2), (loss_ovh, ref_full)

    # 5) hostile shapes: 1D prime length (pad + element mask), odd 3D tensor
    #    (free divisor re-factorization to a non-128 lane width), bf16 inputs.
    x1 = jax.random.normal(k3, (4099,), dtype=jnp.float32) * 3.0
    t1 = jax.random.uniform(k4, (4099,), dtype=jnp.float32)
    loss_1d = jax.block_until_ready(sigmoid_bce_sum(x1, t1))
    assert jnp.allclose(loss_1d, _reference(x1, t1), rtol=1e-4, atol=1e-2)

    x3 = x1[:105].reshape(3, 5, 7)
    t3 = t1[:105].reshape(3, 5, 7)
    loss_3d = jax.block_until_ready(sigmoid_bce_sum(x3, t3))
    assert jnp.allclose(loss_3d, _reference(x3, t3), rtol=1e-4, atol=1e-2)

    loss_bf16 = jax.block_until_ready(
        sigmoid_bce_sum(outputs.astype(jnp.bfloat16), targets))
    assert jnp.allclose(loss_bf16, _reference(outputs.astype(jnp.bfloat16), targets),
                        rtol=1e-4, atol=1e-2)

    print("KERNEL_OK")
</pallas_src>

<mosaic_0001>
module attributes {stable_mosaic.version = 11 : i64} {
  func.func @_sigmoid_bce_sum_kernel(%arg0: i32, %arg1: i32, %arg2: memref<40x128xf32, #tpu.memory_space<vmem>>, %arg3: memref<40x128xf32, #tpu.memory_space<vmem>>, %arg4: memref<8x128xf32, #tpu.memory_space<vmem>>) attributes {dimension_semantics = [#tpu.dimension_semantics<parallel>, #tpu.dimension_semantics<arbitrary>], iteration_bounds = array<i64: 1, 1>, scalar_prefetch = 0 : i64, scratch_operands = 0 : i64, tpu.core_type = #tpu.core_type<tc>, window_params = [{transform_indices = @transform_0, window_bounds = array<i64: 40, 128>}, {transform_indices = @transform_1, window_bounds = array<i64: 40, 128>}, {transform_indices = @transform_2, window_bounds = array<i64: 8, 128>}]} {
    %c1_i32 = arith.constant 1 : i32
    %0 = arith.muli %arg0, %c1_i32 : i32
    %1 = arith.addi %0, %arg1 : i32
    %c0_i32 = arith.constant 0 : i32
    %2 = arith.cmpi eq, %arg1, %c0_i32 : i32
    %3 = arith.extui %2 : i1 to i32
    %c0_i32_0 = arith.constant 0 : i32
    %4 = arith.cmpi ne, %3, %c0_i32_0 : i32
    scf.if %4 {
      %cst_14 = arith.constant 0.000000e+00 : f32
      %35 = vector.broadcast %cst_14 : f32 to vector<8x128xf32>
      %c0_15 = arith.constant 0 : index
      %c0_16 = arith.constant 0 : index
      %36 = vector.load %arg4[%c0_15, %c0_16] : memref<8x128xf32, #tpu.memory_space<vmem>>, vector<8x128xf32>
      tpu.vector_store %arg4[%c0_15, %c0_16], %35 {strides = array<i32>} : memref<8x128xf32, #tpu.memory_space<vmem>>, vector<8x128xf32>,
    } else {
    }
    %c0 = arith.constant 0 : index
    %c0_1 = arith.constant 0 : index
    %5 = vector.load %arg2[%c0, %c0_1] : memref<40x128xf32, #tpu.memory_space<vmem>>, vector<40x128xf32>
    %c0_2 = arith.constant 0 : index
    %c0_3 = arith.constant 0 : index
    %6 = vector.load %arg3[%c0_2, %c0_3] : memref<40x128xf32, #tpu.memory_space<vmem>>, vector<40x128xf32>
    %7 = math.absf %5 : vector<40x128xf32>
    %cst = arith.constant 0.000000e+00 : f32
    %8 = vector.broadcast %cst : f32 to vector<40x128xf32>
    %9 = arith.subf %8, %7 : vector<40x128xf32>
    %10 = math.exp %9 : vector<40x128xf32>
    %cst_4 = arith.constant 1.000000e+00 : f32
    %11 = vector.broadcast %cst_4 : f32 to vector<40x128xf32>
    %12 = arith.addf %11, %10 : vector<40x128xf32>
    %13 = math.log %12 : vector<40x128xf32>
    %cst_5 = arith.constant 0.000000e+00 : f32
    %14 = vector.broadcast %cst_5 : f32 to vector<40x128xf32>
    %15 = arith.maximumf %5, %14 : vector<40x128xf32>
    %16 = arith.mulf %5, %6 : vector<40x128xf32>
    %17 = arith.subf %15, %16 : vector<40x128xf32>
    %18 = arith.addf %17, %13 : vector<40x128xf32>
    %cst_6 = arith.constant 1.000000e+02 : f32
    %19 = vector.broadcast %cst_6 : f32 to vector<40x128xf32>
    %20 = arith.mulf %19, %6 : vector<40x128xf32>
    %cst_7 = arith.constant 16.6355324 : f32
    %21 = vector.broadcast %cst_7 : f32 to vector<40x128xf32>
    %22 = arith.cmpf ogt, %5, %21 : vector<40x128xf32>
    %cst_8 = arith.constant 1.000000e+02 : f32
    %23 = vector.broadcast %cst_8 : f32 to vector<40x128xf32>
    %24 = arith.subf %23, %20 : vector<40x128xf32>
    %25 = arith.select %22, %24, %18 : vector<40x128xi1>, vector<40x128xf32>
    %cst_9 = arith.constant -88.7228394 : f32
    %26 = vector.broadcast %cst_9 : f32 to vector<40x128xf32>
    %27 = arith.cmpf olt, %5, %26 : vector<40x128xf32>
    %28 = arith.select %27, %20, %25 : vector<40x128xi1>, vector<40x128xf32>
    %c0_i32_10 = arith.constant 0 : i32
    %29 = arith.cmpi sge, %1, %c0_i32_10 : i32
    %30 = arith.extui %29 : i1 to i32
    %c0_i32_11 = arith.constant 0 : i32
    %31 = arith.cmpi ne, %30, %c0_i32_11 : i32
    scf.if %31 {
      %c40_i32 = arith.constant 40 : i32
      %35 = arith.muli %1, %c40_i32 : i32
      %36 = tpu.iota {dimensions = array<i32: 0>} : vector<40x1xi32>
      %37 = vector.broadcast %35 : i32 to vector<40x1xi32>
      %38 = arith.addi %37, %36 : vector<40x1xi32>
      %39 = tpu.iota {dimensions = array<i32: 1>} : vector<1x128xi32>
      %c37_i32 = arith.constant 37 : i32
      %40 = vector.broadcast %c37_i32 : i32 to vector<40x1xi32>
      %41 = arith.cmpi slt, %38, %40 : vector<40x1xi32>
      %c37_i32_14 = arith.constant 37 : i32
      %42 = vector.broadcast %c37_i32_14 : i32 to vector<40x1xi32>
      %43 = arith.cmpi eq, %38, %42 : vector<40x1xi32>
      %c0_i32_15 = arith.constant 0 : i32
      %44 = vector.broadcast %c0_i32_15 : i32 to vector<1x128xi32>
      %45 = arith.cmpi slt, %39, %44 : vector<1x128xi32>
      %46 = vector.broadcast %43 : vector<40x1xi1> to vector<40x128xi1>
      %47 = vector.broadcast %45 : vector<1x128xi1> to vector<40x128xi1>
      %48 = arith.andi %46, %47 : vector<40x128xi1>
      %49 = vector.broadcast %41 : vector<40x1xi1> to vector<40x128xi1>
      %50 = arith.ori %49, %48 : vector<40x128xi1>
      %cst_16 = arith.constant 0.000000e+00 : f32
      %51 = vector.broadcast %cst_16 : f32 to vector<40x128xf32>
      %52 = arith.select %50, %28, %51 : vector<40x128xi1>, vector<40x128xf32>
      %c0_17 = arith.constant 0 : index
      %c0_18 = arith.constant 0 : index
      %53 = vector.load %arg4[%c0_17, %c0_18] : memref<8x128xf32, #tpu.memory_space<vmem>>, vector<8x128xf32>
      %54 = vector.shape_cast %52 : vector<40x128xf32> to vector<5x8x128xf32>
      %cst_19 = arith.constant dense<0.000000e+00> : vector<8x128xf32>
      %55 = vector.multi_reduction <add>, %54, %cst_19 [0] : vector<5x8x128xf32> to vector<8x128xf32>
      %56 = arith.addf %53, %55 : vector<8x128xf32>
      %c0_20 = arith.constant 0 : index
      %c0_21 = arith.constant 0 : index
      %57 = vector.load %arg4[%c0_20, %c0_21] : memref<8x128xf32, #tpu.memory_space<vmem>>, vector<8x128xf32>
      tpu.vector_store %arg4[%c0_20, %c0_21], %56 {strides = array<i32>} : memref<8x128xf32, #tpu.memory_space<vmem>>, vector<8x128xf32>,
    } else {
    }
    %c0_i32_12 = arith.constant 0 : i32
    %32 = arith.cmpi slt, %1, %c0_i32_12 : i32
    %33 = arith.extui %32 : i1 to i32
    %c0_i32_13 = arith.constant 0 : i32
    %34 = arith.cmpi ne, %33, %c0_i32_13 : i32
    scf.if %34 {
      %c0_14 = arith.constant 0 : index
      %c0_15 = arith.constant 0 : index
      %35 = vector.load %arg4[%c0_14, %c0_15] : memref<8x128xf32, #tpu.memory_space<vmem>>, vector<8x128xf32>
      %36 = vector.shape_cast %28 : vector<40x128xf32> to vector<5x8x128xf32>
      %cst_16 = arith.constant dense<0.000000e+00> : vector<8x128xf32>
      %37 = vector.multi_reduction <add>, %36, %cst_16 [0] : vector<5x8x128xf32> to vector<8x128xf32>
      %38 = arith.addf %35, %37 : vector<8x128xf32>
      %c0_17 = arith.constant 0 : index
      %c0_18 = arith.constant 0 : index
      %39 = vector.load %arg4[%c0_17, %c0_18] : memref<8x128xf32, #tpu.memory_space<vmem>>, vector<8x128xf32>
      tpu.vector_store %arg4[%c0_17, %c0_18], %38 {strides = array<i32>} : memref<8x128xf32, #tpu.memory_space<vmem>>, vector<8x128xf32>,
    } else {
    }
    return
  }
  func.func @transform_0(%arg0: i32, %arg1: i32) -> (i32, i32) {
    %c1_i32 = arith.constant 1 : i32
    %0 = arith.muli %arg0, %c1_i32 : i32
    %1 = arith.addi %0, %arg1 : i32
    %c0_i32 = arith.constant 0 : i32
    %c0_i32_0 = arith.constant 0 : i32
    return %1, %c0_i32 : i32, i32
  }
  func.func @transform_1(%arg0: i32, %arg1: i32) -> (i32, i32) {
    %c1_i32 = arith.constant 1 : i32
    %0 = arith.muli %arg0, %c1_i32 : i32
    %1 = arith.addi %0, %arg1 : i32
    %c0_i32 = arith.constant 0 : i32
    %c0_i32_0 = arith.constant 0 : i32
    return %1, %c0_i32 : i32, i32
  }
  func.func @transform_2(%arg0: i32, %arg1: i32) -> (i32, i32) {
    %c0_i32 = arith.constant 0 : i32
    %c0_i32_0 = arith.constant 0 : i32
    return %arg0, %c0_i32 : i32, i32
  }
}

</mosaic_0001>

<bundles_post_ra>
// kernel: tpu_custom_call.1
= control target key start
LH: loop header
LB: loop body
LE: loop exit
PB: predicated region body
PF: predicated region fallthrough
CT: control target
= control target key end

     0   :  { %7 = vsyncpa [#allocation3], 0  ;;  %s453_s0 = inlined_call_operand.hbm [shape: f32[37,128], index: 0, kind: input, shape index: {}]   ;;  %s454_s1 = inlined_call_operand.hbm [shape: f32[37,128], index: 1, kind: input, shape index: {}]   ;;  %s455_s2 = inlined_call_operand.hbm [shape: f32[8,128], index: 2, kind: output, shape index: {}]  }
   0x1   :  { %8 = vsyncpa [#allocation6], 0 }
   0x2   :  { %9 = vsyncpa [#allocation4], 0  ;;  %s352_s9 = smov [#allocation2]   ;;  %s280_s13 = scalar_lea.hbm %s453_s0, 640 }
   0x3   :  { %s19_s10 = sshll.u32 %s352_s9, 4  ;;  %p281_p0 = scmp.ne.s32.totalorder %s453_s0, %s280_s13  ;;  %s20_s10 = int_to_ptr.vmem [resolvable:$true] %s19_s10 }
   0x4   :  { %p284_p1 = scmp.lt.u32.totalorder %s280_s13, %s453_s0 }
   0x6   :  { %p286_p2 = pnand %p284_p1, %p281_p0 }
   0x8   :  { %289 = shalt.err (!%p286_p2)
}
   0x9   :  { %s290_s18 = scalar_lea.vmem %s20_s10, 640  ;;  %p295_p4 = scmp.lt.s32.totalorder %s20_s10, %s20_s10 }
   0xa   :  { %p291_p3 = scmp.ne.s32.totalorder %s20_s10, %s290_s18  ;;  %p296_p5 = scmp.lt.s32.totalorder %s290_s18, %s290_s18 }
   0xc   :  { %p297_p6 = por %p296_p5, %p295_p4 }
   0xe   :  { %p298_p7 = pnand %p297_p6, %p291_p3 }
  0x10   :  { %301 = shalt.err (!%p298_p7)
}
  0x11   :  { %s353_s19 = smov 128   ;;  %s354_s20 = smov 8  }
  0x12   :  { %25 = dma.hbm_to_vmem [thread:$0]  %s453_s0, 640, %s20_s10, [#allocation3], %s353_s19, %s353_s19, %s354_s20  }
  0x13   :  { %s355_s23 = smov [#allocation5]   ;;  %s302_s27 = scalar_lea.hbm %s454_s1, 640 }
  0x14   :  { %s35_s24 = sshll.u32 %s355_s23, 4  ;;  %p303_p8 = scmp.ne.s32.totalorder %s454_s1, %s302_s27  ;;  %s36_s24 = int_to_ptr.vmem [resolvable:$true] %s35_s24 }
  0x15   :  { %p306_p9 = scmp.lt.u32.totalorder %s302_s27, %s454_s1 }
  0x17   :  { %p308_p10 = pnand %p306_p9, %p303_p8 }
  0x19   :  { %311 = shalt.err (!%p308_p10)
}
  0x1a   :  { %s312_s4 = scalar_lea.vmem %s36_s24, 640  ;;  %p317_p12 = scmp.lt.s32.totalorder %s36_s24, %s36_s24 }
  0x1b   :  { %p313_p11 = scmp.ne.s32.totalorder %s36_s24, %s312_s4  ;;  %p318_p13 = scmp.lt.s32.totalorder %s312_s4, %s312_s4 }
  0x1d   :  { %p319_p0 = por %p318_p13, %p317_p12 }
  0x1f   :  { %p320_p1 = pnand %p319_p0, %p313_p11 }
  0x21   :  { %323 = shalt.err (!%p320_p1)
}
  0x22   :  { %41 = dma.hbm_to_vmem [thread:$0]  %s454_s1, 640, %s36_s24, [#allocation6], %s353_s19, %s353_s19, %s354_s20  }
  0x23   :  { %346 = dma.done.wait [#allocation3], 640  }
  0x24   :  { %347 = vsyncadd [#allocation3], 4294966656 }
  0x25   :  { %348 = dma.done.wait [#allocation6], 640  }
  0x26   :  { %349 = vsyncadd [#allocation6], 4294966656  ;;  %v396_v0 = vld [vmem:[#allocation2] sm:$0xff]  ;;  %v398_v1 = vld [vmem:[#allocation2 + $0x8] sm:$0xff]  ;;  %v158_v27 = vlaneseq  ;;  %s356_s1 = smov [#allocation7]  }
  0x27   :  { %v400_v2 = vld [vmem:[#allocation2 + $0x10] sm:$0xff]  ;;  %v402_v3 = vld [vmem:[#allocation2 + $0x18] sm:$0xff]  ;;  %v404_v4 = vld [vmem:[#allocation2 + $0x20] sm:$0xff]  ;;  %v68_v5 = vand.u32 2147483647, %v396_v0  ;;  %v103_v36 = vmax.f32 %v396_v0, 0.0 }
  0x28   :  { %v69_v6 = vand.u32 2147483647, %v398_v1  ;;  %v70_v7 = vand.u32 2147483647, %v400_v2  ;;  %v71_v8 = vand.u32 2147483647, %v402_v3 }
  0x29   :  { %v73_v9 = vsub.f32 0.0, %v68_v5  ;;  %v72_v10 = vand.u32 2147483647, %v404_v4  ;;  %v63_v29 = vld [vmem:[#allocation5] sm:$0xff]  ;;  %v64_v31 = vld [vmem:[#allocation5 + $0x8] sm:$0xff]  ;;  %v65_v32 = vld [vmem:[#allocation5 + $0x10] sm:$0xff] }
  0x2a   :  { %v74_v11 = vsub.f32 0.0, %v69_v6  ;;  %v75_v12 = vsub.f32 0.0, %v70_v7  ;;  %v76_v13 = vsub.f32 0.0, %v71_v8  ;;  %v66_v34 = vld [vmem:[#allocation5 + $0x18] sm:$0xff]  ;;  %v67_v35 = vld [vmem:[#allocation5 + $0x20] sm:$0xff]  ;;  %v108_v37 = vmul.f32 %v63_v29, %v396_v0  ;;  %s244_s6 = sshll.u32 %s356_s1, 4  ;;  %s245_s6 = int_to_ptr.vmem [resolvable:$true] %s244_s6 }
  0x2b   :  { %v78_v14 = vmul.f32 1.442695, %v73_v9  ;;  %v77_v15 = vsub.f32 0.0, %v72_v10  ;;  %v159_v38 = vshrl.u32 %v158_v27, 7  ;;  %v104_v39 = vmax.f32 %v398_v1, 0.0  ;;  %s324_s7 = scalar_lea.vmem %s245_s6, 128  ;;  %p329_p3 = scmp.lt.s32.totalorder %s245_s6, %s245_s6 }
  0x2c   :  { %v80_v16 = vmul.f32 1.442695, %v74_v11  ;;  %v82_v17 = vmul.f32 1.442695, %v75_v12  ;;  %v84_v18 = vmul.f32 1.442695, %v76_v13  ;;  %v109_v41 = vmul.f32 %v64_v31, %v398_v1  ;;  %p325_p2 = scmp.ne.s32.totalorder %s245_s6, %s324_s7  ;;  %p330_p4 = scmp.lt.s32.totalorder %s324_s7, %s324_s7 }
  0x2d   :  { %260 = vpow2.f32 %v78_v14  ;;  %v86_v19 = vmul.f32 1.442695, %v77_v15  ;;  %v105_v40 = vmax.f32 %v400_v2, 0.0  ;;  %v110_v42 = vmul.f32 %v65_v32, %v400_v2 }
  0x2e   :  { %262 = vpow2.f32 %v80_v16  ;;  %v106_v43 = vmax.f32 %v402_v3, 0.0  ;;  %v111_v44 = vmul.f32 %v66_v34, %v402_v3  ;;  %v107_v45 = vmax.f32 %v404_v4, 0.0  ;;  %p331_p5 = por %p330_p4, %p329_p3 }
  0x2f   :  { %264 = vpow2.f32 %v82_v17  ;;  %v112_v46 = vmul.f32 %v67_v35, %v404_v4  ;;  %v123_v47 = vmul.f32 100.0, %v63_v29  ;;  %v113_v48 = vsub.f32 %v103_v36, %v108_v37 }
  0x30   :  { %266 = vpow2.f32 %v84_v18  ;;  %v124_v49 = vmul.f32 100.0, %v64_v31  ;;  %v125_v50 = vmul.f32 100.0, %v65_v32  ;;  %v163_v51 = vadd.s32 32, %v159_v38  ;;  %p332_p6 = pnand %p331_p5, %p325_p2 }
  0x31   :  { %268 = vpow2.f32 %v86_v19  ;;  %v114_v52 = vsub.f32 %v104_v39, %v109_v41  ;;  %v115_v53 = vsub.f32 %v105_v40, %v110_v42  ;;  %v126_v54 = vmul.f32 100.0, %v66_v34 }
  0x32   :  { %v127_v55 = vmul.f32 100.0, %v67_v35  ;;  %v116_v57 = vsub.f32 %v106_v43, %v111_v44  ;;  %vm128_vm0 = vcmp.gt.f32.partialorder %v396_v0, 16.635532  ;;  %vm129_vm1 = vcmp.gt.f32.partialorder %v398_v1, 16.635532 }
  0x33   :  { %vm130_vm2 = vcmp.gt.f32.partialorder %v400_v2, 16.635532  ;;  %v117_v60 = vsub.f32 %v107_v45, %v112_v46  ;;  %vm131_vm3 = vcmp.gt.f32.partialorder %v402_v3, 16.635532  ;;  %v133_v61 = vsub.f32 100.0, %v123_v47 }
  0x34   :  { %vm132_vm4 = vcmp.gt.f32.partialorder %v404_v4, 16.635532  ;;  %v134_v5 = vsub.f32 100.0, %v124_v49  ;;  %v135_v6 = vsub.f32 100.0, %v125_v50  ;;  %v136_v10 = vsub.f32 100.0, %v126_v54 }
  0x35   :  { %vm143_vm5 = vcmp.lt.f32.partialorder %v396_v0, -88.72284  ;;  %v137_v14 = vsub.f32 100.0, %v127_v55  ;;  %vm144_vm6 = vcmp.lt.f32.partialorder %v398_v1, -88.72284  ;;  %vm176_vm10 = vcmp.lt.s32.totalorder %v163_v51, 37 }
  0x36   :  { %vm145_vm7 = vcmp.lt.f32.partialorder %v400_v2, -88.72284  ;;  %vm146_vm8 = vcmp.lt.f32.partialorder %v402_v3, -88.72284  ;;  %vm147_vm9 = vcmp.lt.f32.partialorder %v404_v4, -88.72284 }
  0x37   :  { %v261_v20 = vpop.eup %260 }
  0x38   :  { %v263_v21 = vpop.eup %262  ;;  %v88_v22 = vadd.f32 1.0, %v261_v20 }
  0x39   :  { %v265_v23 = vpop.eup %264  ;;  %v89_v24 = vadd.f32 1.0, %v263_v21 }
  0x3a   :  { %v267_v25 = vpop.eup %266  ;;  %v90_v26 = vadd.f32 1.0, %v265_v23  ;;  %270 = vlog2.f32 %v88_v22 }
  0x3b   :  { %v269_v28 = vpop.eup %268  ;;  %v91_v30 = vadd.f32 1.0, %v267_v25  ;;  %272 = vlog2.f32 %v89_v24 }
  0x3c   :  { %v92_v33 = vadd.f32 1.0, %v269_v28  ;;  %274 = vlog2.f32 %v90_v26 }
  0x3d   :  { %276 = vlog2.f32 %v91_v30 }
  0x3e   :  { %278 = vlog2.f32 %v92_v33 }
  0x44   :  { %v271_v56 = vpop.eup %270 }
  0x45   :  { %v273_v58 = vpop.eup %272  ;;  %v94_v59 = vmul.f32 0.6931472, %v271_v56 }
  0x46   :  { %v275_v62 = vpop.eup %274  ;;  %v96_v63 = vmul.f32 0.6931472, %v273_v58 }
  0x47   :  { %v277_v7 = vpop.eup %276  ;;  %v98_v8 = vmul.f32 0.6931472, %v275_v62  ;;  %v118_v9 = vadd.f32 %v113_v48, %v94_v59 }
  0x48   :  { %v279_v11 = vpop.eup %278  ;;  %v100_v12 = vmul.f32 0.6931472, %v277_v7  ;;  %v119_v13 = vadd.f32 %v114_v52, %v96_v63 }
  0x49   :  { %v102_v15 = vmul.f32 0.6931472, %v279_v11  ;;  %v120_v16 = vadd.f32 %v115_v53, %v98_v8  ;;  %v138_v17 = vsel %vm128_vm0, %v133_v61, %v118_v9 }
  0x4a   :  { %v121_v18 = vadd.f32 %v116_v57, %v100_v12  ;;  %v139_v19 = vsel %vm129_vm1, %v134_v5, %v119_v13  ;;  %v148_v20 = vsel %vm143_vm5, %v123_v47, %v138_v17 }
  0x4b   :  { %v122_v21 = vadd.f32 %v117_v60, %v102_v15  ;;  %v140_v22 = vsel %vm130_vm2, %v135_v6, %v120_v16  ;;  %v149_v23 = vsel %vm144_vm6, %v124_v49, %v139_v19 }
  0x4c   :  { %v141_v0 = vsel %vm131_vm3, %v136_v10, %v121_v18  ;;  %v150_v24 = vsel %vm145_vm7, %v125_v50, %v140_v22  ;;  %v221_v25 = vadd.f32 %v149_v23, %v148_v20 }
  0x4d   :  { %v142_v1 = vsel %vm132_vm4, %v137_v14, %v122_v21  ;;  %v151_v26 = vsel %vm146_vm8, %v126_v54, %v141_v0 }
  0x4e   :  { %v152_v27 = vsel %vm147_vm9, %v127_v55, %v142_v1  ;;  %v222_v28 = vadd.f32 %v221_v25, %v150_v24 }
  0x4f   :  { %v219_v29 = vsel %vm176_vm10, %v152_v27, 0.0 }
  0x50   :  { %v223_v30 = vadd.f32 %v222_v28, %v151_v26 }
  0x52   :  { %v224_v2 = vadd.f32 %v223_v30, %v219_v29 }
  0x54   :  { %226 = vst [vmem:[#allocation7] sm:$0xff] %v224_v2 }
  0x55   :  { %335 = shalt.err (!%p332_p6)
}
  0x56   :  { %s336_s10 = scalar_lea.hbm %s455_s2, 128 }
  0x57   :  { %p337_p7 = scmp.ne.s32.totalorder %s455_s2, %s336_s10  ;;  %p340_p8 = scmp.lt.u32.totalorder %s336_s10, %s455_s2 }
  0x59   :  { %p342_p9 = pnand %p340_p8, %p337_p7 }
  0x5b   :  { %345 = shalt.err (!%p342_p9)
}
  0x5c   :  { %247 = dma.vmem_to_hbm [thread:$0]  %s245_s6, 128, %s455_s2, [#allocation4]  }
  0x5d   :  { %350 = dma.done.wait [#allocation4], 128  }
  0x5e   :  { %351 = vsyncadd [#allocation4], 4294967168 }
  0x5f   :  { %251 = vsyncpa [#allocation3], 1 }
  0x60   :  { %252 = vsyncpa [#allocation6], 1 }
  0x61   :  { %253 = vsyncpa [#allocation4], 1 }

</bundles_post_ra>
